<compile_context>
chip_gen: v5e
topology: v5e:2x2
jax: 0.10.0
libtpu: 0.0.40
codegen_flags: <defaults>
</compile_context>

<pallas_src>
import functools

import jax
import jax.numpy as jnp
from jax import lax
from jax.experimental import pallas as pl
from jax.experimental.pallas import tpu as pltpu


def _round_up(x, m):
    return ((x + m - 1) // m) * m


def _cdiv(a, b):
    return (a + b - 1) // b


def _make_cbf_kernel(state_dim, hidden_dim, num_layers, row_stride):
    """Builds the per-batch-tile kernel.

    Ref shapes seen by the kernel:
      x_ref    : (TB, state_dim)                     f32, batch-major tile
      w_ref    : (num_layers*row_stride, max(S, H))  bf16 packed hidden weights
      tail_ref : (hidden_dim, num_layers + 2)        f32; col 0 = output-weight
                 column, cols 1..L = hidden biases, [0, L+1] = output bias
      o_ref    : (1, TB)                             f32, lane-dense output
    """

    def kernel(x_ref, w_ref, tail_ref, o_ref):
        tail = tail_ref[...]                                      # (H, L+2) f32
        x = x_ref[...].astype(jnp.bfloat16)                       # (TB, S)

        # Layer 1: (H, S) x (TB, S)^T -> (H, TB).  Contracting on x's minor
        # dim lets Mosaic do the batch-major -> feature-major flip on-chip.
        w1 = w_ref[0:hidden_dim, 0:state_dim]
        h = lax.dot_general(w1, x, (((1,), (1,)), ((), ())),
                            preferred_element_type=jnp.float32)
        h = jnp.maximum(h + tail[:, 1:2], 0.0)

        # Remaining hidden layers: (H, H) x (H, TB) -> (H, TB), bf16 MXU
        # operands, f32 accumulation, bias/ReLU in f32.
        for l in range(1, num_layers):
            r0 = l * row_stride
            wl = w_ref[r0:r0 + hidden_dim, 0:hidden_dim]
            h = jnp.dot(wl, h.astype(jnp.bfloat16),
                        preferred_element_type=jnp.float32)
            h = jnp.maximum(h + tail[:, l + 1:l + 2], 0.0)

        # Output layer (H -> 1): VPU multiply + sublane reduce; the result
        # lands directly in the lane-dense (1, TB) layout -> unmasked stores.
        w_out = tail[:, 0:1]                                      # (H, 1)
        b_out = tail[0:1, num_layers + 1:num_layers + 2]          # (1, 1)
        o = jnp.sum(h * w_out, axis=0, keepdims=True) + b_out     # (1, TB)
        o_ref[...] = jnp.tanh(o).astype(o_ref.dtype)

    return kernel


def _pack_params(params, state_dim, hidden_dim, num_layers, row_stride, cols):
    """Packs torch-layout params into two small VMEM-resident slabs."""
    # bf16 hidden-layer weight slab (layer l occupies rows [l*row_stride, +H)).
    w_slab = jnp.zeros((num_layers * row_stride, cols), jnp.bfloat16)
    for l in range(num_layers):
        W = params[l][0]                                          # (H, in)
        r0 = l * row_stride
        w_slab = w_slab.at[r0:r0 + W.shape[0], 0:W.shape[1]].set(
            W.astype(jnp.bfloat16))

    # f32 tail: output-weight column, hidden biases, output bias.
    tail = jnp.zeros((hidden_dim, num_layers + 2), jnp.float32)
    w_out, b_out = params[num_layers]                             # (1, H), (1, 1)
    tail = tail.at[:, 0].set(w_out.reshape(hidden_dim).astype(jnp.float32))
    for l in range(num_layers):
        tail = tail.at[:, l + 1].set(
            params[l][1].reshape(hidden_dim).astype(jnp.float32))
    tail = tail.at[0, num_layers + 1].set(b_out.reshape(()).astype(jnp.float32))
    return w_slab, tail


@functools.partial(jax.jit, static_argnames="tile_b")
def cbf_forward(state, params, tile_b=8192):
    """state: (B, state_dim) f32.

    params: list of (W, b) pairs in torch layout, W (out, in), b (out, 1).
    Returns (B, 1) f32, matching CBF.forward (hidden ReLU, output Tanh).
    """
    B, state_dim = state.shape
    hidden_dim = params[0][0].shape[0]
    num_layers = len(params) - 1

    # Batch tile: a multiple of 128 lanes, biased large so the fixed per-step
    # pipeline overhead is amortized, but chosen so batches bigger than one
    # tile split into >= 2 roughly balanced tiles (v7x megacore sharding of
    # the "parallel" batch axis).
    n_pairs = max(1, _cdiv(B, 2 * tile_b))
    TB = max(128, min(tile_b, _round_up(_cdiv(B, 2 * n_pairs), 128)))
    grid = (_cdiv(B, TB),)

    # Pack the ~9 KiB of weights/biases into two resident slabs.
    row_stride = _round_up(hidden_dim, 32)
    cols = max(state_dim, hidden_dim)
    w_slab, tail = _pack_params(params, state_dim, hidden_dim, num_layers,
                                row_stride, cols)

    kernel = _make_cbf_kernel(state_dim, hidden_dim, num_layers, row_stride)

    compiler_kwargs = dict(dimension_semantics=("parallel",))
    if TB >= 4096:
        # The (TB, state_dim) input tile is lane-padded to 128 lanes in VMEM;
        # give Mosaic headroom beyond v5e's 16 MiB default scoped limit
        # (48 MiB stays below every generation's physical VMEM).
        compiler_kwargs["vmem_limit_bytes"] = 48 * 1024 * 1024

    out = pl.pallas_call(
        kernel,
        out_shape=jax.ShapeDtypeStruct((1, B), jnp.float32),
        grid=grid,
        in_specs=[
            # Batch tile straight from HBM: no wrapper transpose / pad; the
            # edge tile is handled by Pallas' OOB masking.
            pl.BlockSpec((TB, state_dim), lambda i: (i, 0)),
            # Weight slabs: constant index maps -> VMEM-resident, DMA'd once.
            pl.BlockSpec(w_slab.shape, lambda i: (0, 0)),
            pl.BlockSpec(tail.shape, lambda i: (0, 0)),
        ],
        out_specs=pl.BlockSpec((1, TB), lambda i: (0, i)),
        compiler_params=pltpu.CompilerParams(**compiler_kwargs),
    )(state.astype(jnp.float32), w_slab, tail)

    # (1, B) -> (B, 1) preserves the flat element order (pure reshape).
    return out.reshape(B, 1)


def init_cbf_params(key, state_dim, hidden_dim, num_layers):
    """torch.nn.Linear-style init: W (out, in), b (out, 1), U(+-1/sqrt(fan_in))."""
    sizes = [state_dim] + num_layers * [hidden_dim] + [1]
    params = []
    for j in range(len(sizes) - 1):
        fan_in, fan_out = sizes[j], sizes[j + 1]
        key, kw, kb = jax.random.split(key, 3)
        bound = 1.0 / (fan_in ** 0.5)
        W = jax.random.uniform(kw, (fan_out, fan_in), jnp.float32, -bound, bound)
        b = jax.random.uniform(kb, (fan_out, 1), jnp.float32, -bound, bound)
        params.append((W, b))
    return params


def cbf_reference(state, params):
    """Plain-JAX f32 reference of the same forward pass (torch-layout params)."""
    h = state
    for i, (W, b) in enumerate(params):
        h = h @ W.T + b.T
        if i < len(params) - 1:
            h = jnp.maximum(h, 0.0)
        else:
            h = jnp.tanh(h)
    return h


if __name__ == "__main__":
    # Shapes consistent with CBF(num_action=2, state_dim=4, hidden_dim=32,
    # num_layers=3).  Small-batch calls are launch-overhead dominated; the
    # tiling pays off for batches in the thousands and up.
    state_dim, hidden_dim, num_layers = 4, 32, 3

    key = jax.random.PRNGKey(0)
    k_params, k_small, k_big = jax.random.split(key, 3)
    params = init_cbf_params(k_params, state_dim, hidden_dim, num_layers)

    # bf16 MXU operands (f32 accumulation) -> compare against the f32
    # reference with a matching tolerance.
    tol = dict(atol=2e-2, rtol=2e-2)

    state_small = jax.random.normal(k_small, (8, state_dim), dtype=jnp.float32)
    out_small = jax.block_until_ready(cbf_forward(state_small, params))
    assert out_small.shape == (8, 1)
    assert jnp.allclose(out_small, cbf_reference(state_small, params), **tol)

    # A batch that exercises a multi-tile grid plus a partial edge tile.
    state_big = jax.random.normal(k_big, (1000, state_dim), dtype=jnp.float32)
    out_big = jax.block_until_ready(cbf_forward(state_big, params))
    assert out_big.shape == (1000, 1)
    assert jnp.allclose(out_big, cbf_reference(state_big, params), **tol)

    print("KERNEL_OK")
</pallas_src>

<mosaic_0001>
module attributes {stable_mosaic.version = 11 : i64} {
  func.func @kernel(%arg0: i32, %arg1: memref<128x4xf32, #tpu.memory_space<vmem>>, %arg2: memref<96x32xbf16, #tpu.memory_space<vmem>>, %arg3: memref<32x5xf32, #tpu.memory_space<vmem>>, %arg4: memref<1x128xf32, #tpu.memory_space<vmem>>) attributes {dimension_semantics = [#tpu.dimension_semantics<parallel>], iteration_bounds = array<i64: 1>, scalar_prefetch = 0 : i64, scratch_operands = 0 : i64, tpu.core_type = #tpu.core_type<tc>, window_params = [{transform_indices = @transform_0, window_bounds = array<i64: 128, 4>}, {pipeline_mode = #tpu.pipeline_mode<synchronous>, transform_indices = @transform_1, window_bounds = array<i64: 96, 32>}, {pipeline_mode = #tpu.pipeline_mode<synchronous>, transform_indices = @transform_2, window_bounds = array<i64: 32, 5>}, {transform_indices = @transform_3, window_bounds = array<i64: 1, 128>}]} {
    %c0 = arith.constant 0 : index
    %c0_0 = arith.constant 0 : index
    %0 = vector.load %arg3[%c0, %c0_0] : memref<32x5xf32, #tpu.memory_space<vmem>>, vector<32x5xf32>
    %c0_1 = arith.constant 0 : index
    %c0_2 = arith.constant 0 : index
    %1 = vector.load %arg1[%c0_1, %c0_2] : memref<128x4xf32, #tpu.memory_space<vmem>>, vector<128x4xf32>
    %2 = arith.truncf %1 : vector<128x4xf32> to vector<128x4xbf16>
    %c0_3 = arith.constant 0 : index
    %c0_4 = arith.constant 0 : index
    %3 = vector.load %arg2[%c0_3, %c0_4] : memref<96x32xbf16, #tpu.memory_space<vmem>>, vector<32x4xbf16>
    %cst = arith.constant dense<0.000000e+00> : vector<32x128xf32>
    %4 = tpu.matmul %3, %2, %cst {dimension_numbers = #tpu.dot_dimension_numbers<[1], [1], [0], [0], [0, 0, 1, 0], [], []>} : vector<32x4xbf16>, vector<128x4xbf16>, vector<32x128xf32> -> vector<32x128xf32>
    %5 = vector.extract_strided_slice %0 {offsets = [0, 1], sizes = [32, 1], strides = [1, 1]} : vector<32x5xf32> to vector<32x1xf32>
    %6 = vector.broadcast %5 : vector<32x1xf32> to vector<32x128xf32>
    %7 = arith.addf %4, %6 : vector<32x128xf32>
    %cst_5 = arith.constant 0.000000e+00 : f32
    %8 = vector.broadcast %cst_5 : f32 to vector<32x128xf32>
    %9 = arith.maximumf %7, %8 : vector<32x128xf32>
    %c32 = arith.constant 32 : index
    %c0_6 = arith.constant 0 : index
    %10 = vector.load %arg2[%c32, %c0_6] : memref<96x32xbf16, #tpu.memory_space<vmem>>, vector<32x32xbf16>
    %11 = arith.truncf %9 : vector<32x128xf32> to vector<32x128xbf16>
    %cst_7 = arith.constant dense<0.000000e+00> : vector<32x128xf32>
    %12 = tpu.matmul %10, %11, %cst_7 {dimension_numbers = #tpu.dot_dimension_numbers<[1], [0], [0], [1], [0, 0, 1, 1], [], []>} : vector<32x32xbf16>, vector<32x128xbf16>, vector<32x128xf32> -> vector<32x128xf32>
    %13 = vector.extract_strided_slice %0 {offsets = [0, 2], sizes = [32, 1], strides = [1, 1]} : vector<32x5xf32> to vector<32x1xf32>
    %14 = vector.broadcast %13 : vector<32x1xf32> to vector<32x128xf32>
    %15 = arith.addf %12, %14 : vector<32x128xf32>
    %cst_8 = arith.constant 0.000000e+00 : f32
    %16 = vector.broadcast %cst_8 : f32 to vector<32x128xf32>
    %17 = arith.maximumf %15, %16 : vector<32x128xf32>
    %c64 = arith.constant 64 : index
    %c0_9 = arith.constant 0 : index
    %18 = vector.load %arg2[%c64, %c0_9] : memref<96x32xbf16, #tpu.memory_space<vmem>>, vector<32x32xbf16>
    %19 = arith.truncf %17 : vector<32x128xf32> to vector<32x128xbf16>
    %cst_10 = arith.constant dense<0.000000e+00> : vector<32x128xf32>
    %20 = tpu.matmul %18, %19, %cst_10 {dimension_numbers = #tpu.dot_dimension_numbers<[1], [0], [0], [1], [0, 0, 1, 1], [], []>} : vector<32x32xbf16>, vector<32x128xbf16>, vector<32x128xf32> -> vector<32x128xf32>
    %21 = vector.extract_strided_slice %0 {offsets = [0, 3], sizes = [32, 1], strides = [1, 1]} : vector<32x5xf32> to vector<32x1xf32>
    %22 = vector.broadcast %21 : vector<32x1xf32> to vector<32x128xf32>
    %23 = arith.addf %20, %22 : vector<32x128xf32>
    %cst_11 = arith.constant 0.000000e+00 : f32
    %24 = vector.broadcast %cst_11 : f32 to vector<32x128xf32>
    %25 = arith.maximumf %23, %24 : vector<32x128xf32>
    %26 = vector.extract_strided_slice %0 {offsets = [0, 0], sizes = [32, 1], strides = [1, 1]} : vector<32x5xf32> to vector<32x1xf32>
    %27 = vector.extract_strided_slice %0 {offsets = [0, 4], sizes = [1, 1], strides = [1, 1]} : vector<32x5xf32> to vector<1x1xf32>
    %28 = vector.broadcast %26 : vector<32x1xf32> to vector<32x128xf32>
    %29 = arith.mulf %25, %28 : vector<32x128xf32>
    %cst_12 = arith.constant dense<0.000000e+00> : vector<128xf32>
    %30 = vector.multi_reduction <add>, %29, %cst_12 [0] : vector<32x128xf32> to vector<128xf32>
    %31 = vector.shape_cast %30 : vector<128xf32> to vector<1x128xf32>
    %32 = vector.broadcast %27 : vector<1x1xf32> to vector<1x128xf32>
    %33 = arith.addf %31, %32 : vector<1x128xf32>
    %34 = math.tanh %33 : vector<1x128xf32>
    %c0_13 = arith.constant 0 : index
    %c0_14 = arith.constant 0 : index
    %35 = vector.load %arg4[%c0_13, %c0_14] : memref<1x128xf32, #tpu.memory_space<vmem>>, vector<1x128xf32>
    tpu.vector_store %arg4[%c0_13, %c0_14], %34 {strides = array<i32>} : memref<1x128xf32, #tpu.memory_space<vmem>>, vector<1x128xf32>,
    return
  }
  func.func @transform_0(%arg0: i32) -> (i32, i32) {
    %c0_i32 = arith.constant 0 : i32
    %c0_i32_0 = arith.constant 0 : i32
    return %arg0, %c0_i32 : i32, i32
  }
  func.func @transform_1(%arg0: i32) -> (i32, i32) {
    %c0_i32 = arith.constant 0 : i32
    %c0_i32_0 = arith.constant 0 : i32
    %c0_i32_1 = arith.constant 0 : i32
    return %c0_i32, %c0_i32_0 : i32, i32
  }
  func.func @transform_2(%arg0: i32) -> (i32, i32) {
    %c0_i32 = arith.constant 0 : i32
    %c0_i32_0 = arith.constant 0 : i32
    %c0_i32_1 = arith.constant 0 : i32
    return %c0_i32, %c0_i32_0 : i32, i32
  }
  func.func @transform_3(%arg0: i32) -> (i32, i32) {
    %c0_i32 = arith.constant 0 : i32
    %c0_i32_0 = arith.constant 0 : i32
    return %c0_i32, %arg0 : i32, i32
  }
}

</mosaic_0001>

<bundles_post_ra>
// kernel: cbf_forward.1
= control target key start
LH: loop header
LB: loop body
LE: loop exit
PB: predicated region body
PF: predicated region fallthrough
CT: control target
= control target key end

     0   :  { %vm78_vm0 = vcmask 31744   ;;  %s542_s0 = inlined_call_operand.vmem [shape: f32[8,4], index: 0, kind: input, shape index: {}]   ;;  %s543_s1 = inlined_call_operand.vmem [shape: bf16[96,32], index: 1, kind: input, shape index: {}]   ;;  %s544_s2 = inlined_call_operand.vmem [shape: f32[32,5], index: 2, kind: input, shape index: {}]   ;;  %s545_s3 = inlined_call_operand.hbm [shape: f32[1,8], index: 3, kind: output, shape index: {}]  }
   0x1   :  { %v34_v0 = vld [vmem:[%s542_s0 + $0x70] sm:$0xff]  ;;  %v35_v1 = vld [vmem:[%s542_s0 + $0x78] sm:$0xff]  ;;  %v32_v3 = vld [vmem:[%s542_s0 + $0x60] sm:$0xff] }
   0x2   :  { %v43_v2 = vpack.c.bf16 %v35_v1, %v34_v0  ;;  %v33_v4 = vld [vmem:[%s542_s0 + $0x68] sm:$0xff] }
   0x4   :  { %v107_v5 = vsel %vm78_vm0, %v43_v2, 0 }
   0x5   :  { %8 = vsyncpa [#allocation3], 0  ;;  %343 = vmatpush.bf16.xpose.msra.mxu3 %v107_v5  ;;  %109 = vmatpush.bf16.xpose.msra.mxu0 %v107_v5  ;;  %v42_v6 = vpack.c.bf16 %v33_v4, %v32_v3  ;;  %v30_v8 = vld [vmem:[%s542_s0 + $0x50] sm:$0xff]  ;;  %v31_v9 = vld [vmem:[%s542_s0 + $0x58] sm:$0xff]  ;;  %v396_v25 = vmov 1   ;;  %v397_v39 = vmov 2  }
   0x6   :  { %v41_v10 = vpack.c.bf16 %v31_v9, %v30_v8  ;;  %v28_v12 = vld [vmem:[%s542_s0 + $0x40] sm:$0xff]  ;;  %v29_v13 = vld [vmem:[%s542_s0 + $0x48] sm:$0xff]  ;;  %v26_v16 = vld [vmem:[%s542_s0 + $0x30] sm:$0xff]  ;;  %357 = vset.pattern.permute.xlu0 %v396_v25  ;;  %358 = vset.pattern.permute.xlu1 %v396_v25  ;;  %vm164_vm1 = vcmask 261120   ;;  %v398_v61 = vmov 3   ;;  %v399_v4 = vmov 0  }
   0x7   :  { %v104_v7 = vsel %vm78_vm0, %v42_v6, 0  ;;  %v40_v14 = vpack.c.bf16 %v29_v13, %v28_v12  ;;  %v27_v17 = vld [vmem:[%s542_s0 + $0x38] sm:$0xff]  ;;  %v24_v20 = vld [vmem:[%s542_s0 + $0x20] sm:$0xff]  ;;  %v25_v21 = vld [vmem:[%s542_s0 + $0x28] sm:$0xff]  ;;  %359 = vset.pattern.permute.xlu2 %v397_v39  ;;  %v400_v5 = vmov 4   ;;  %s298_s11 = sshll.u32 %s545_s3, 4  ;;  %s299_s11 = int_to_ptr.hbm [resolvable:$true] %s298_s11 }
   0x8   :  { %v101_v11 = vsel %vm78_vm0, %v41_v10, 0  ;;  %v39_v18 = vpack.c.bf16 %v27_v17, %v26_v16  ;;  %v466_v22 = vld [vmem:[%s544_s2 + $0x10] sm:$0xff]  ;;  %v471_v23 = vld [vmem:[%s544_s2] sm:$0xff]  ;;  %v38_v24 = vpack.c.bf16 %v25_v21, %v24_v20  ;;  %v23_v28 = vld [vmem:[%s542_s0 + $0x18] sm:$0xff] }
   0x9   :  { %v98_v15 = vsel %vm78_vm0, %v40_v14, 0  ;;  %60 = vperm.xlu0 %357, %v466_v22   ;;  %50 = vperm.xlu1 %358, %v471_v23   ;;  %v22_v27 = vld [vmem:[%s542_s0 + $0x10] sm:$0xff]  ;;  %v485_v29 = vld [vmem:[%s544_s2 + $0x18] sm:$0xff]  ;;  %v490_v30 = vld [vmem:[%s544_s2 + $0x8] sm:$0xff] }
   0xa   :  { %v95_v19 = vsel %vm78_vm0, %v39_v18, 0  ;;  %v92_v26 = vsel %vm78_vm0, %v38_v24, 0  ;;  %v37_v31 = vpack.c.bf16 %v23_v28, %v22_v27  ;;  %v20_v33 = vld [vmem:[%s542_s0] sm:$0xff]  ;;  %v21_v34 = vld [vmem:[%s542_s0 + $0x8] sm:$0xff]  ;;  %147 = vperm.xlu2 %359, %v466_v22   ;;  %v339_v58 = vld [vmem:[%s543_s1 + $0x10] sm:$0xff] }
   0xb   :  { %v36_v35 = vpack.c.bf16 %v21_v34, %v20_v33  ;;  %v338_v37 = vld [vmem:[%s543_s1 + $0x8] sm:$0xff]  ;;  %v337_v38 = vld [vmem:[%s543_s1] sm:$0xff]  ;;  %v340_v59 = vld [vmem:[%s543_s1 + $0x18] sm:$0xff] }
   0xc   :  { %v89_v32 = vsel %vm78_vm0, %v37_v31, 0  ;;  %v341_v17 = vld [vmem:[%s543_s1 + $0x20] sm:$0xff]  ;;  %v342_v18 = vld [vmem:[%s543_s1 + $0x28] sm:$0xff]  ;;  %s401_s1 = smov [#allocation2]  }
   0xd   :  { %344 = vmatpush.bf16.xpose.msra.mxu3 %v104_v7  ;;  %110 = vmatpush.bf16.xpose.msra.mxu0 %v104_v7  ;;  %v86_v36 = vsel %vm78_vm0, %v36_v35, 0  ;;  %s296_s8 = sshll.u32 %s401_s1, 4  ;;  %s297_s8 = int_to_ptr.vmem [resolvable:$true] %s296_s8 }
  0x11   :  { %65 = vperm.xlu0 %357, %v485_v29   ;;  %55 = vperm.xlu1 %358, %v490_v30  }
  0x12   :  { %151 = vperm.xlu2 %359, %v485_v29  }
  0x15   :  { %345 = vmatpush.bf16.xpose.msra.mxu3 %v101_v11  ;;  %111 = vmatpush.bf16.xpose.msra.mxu0 %v101_v11 }
  0x19   :  { %360 = vset.pattern.permute.xlu0 %v397_v39  ;;  %361 = vset.pattern.permute.xlu1 %v397_v39 }
  0x1a   :  { %139 = vperm.xlu0 %360, %v471_v23   ;;  %143 = vperm.xlu1 %361, %v490_v30  }
  0x1b   :  { %362 = vset.pattern.permute.xlu2 %v398_v61 }
  0x1c   :  { %201 = vperm.xlu2 %362, %v471_v23  }
  0x1d   :  { %346 = vmatpush.bf16.xpose.msra.mxu3 %v98_v15  ;;  %112 = vmatpush.bf16.xpose.msra.mxu0 %v98_v15 }
  0x22   :  { %363 = vset.pattern.permute.xlu1 %v398_v61  ;;  %364 = vset.pattern.permute.xlu0 %v398_v61 }
  0x23   :  { %205 = vperm.xlu1 %363, %v490_v30   ;;  %213 = vperm.xlu0 %364, %v485_v29  }
  0x24   :  { %209 = vperm.xlu2 %362, %v466_v22  }
  0x25   :  { %347 = vmatpush.bf16.xpose.msra.mxu3 %v95_v19  ;;  %113 = vmatpush.bf16.xpose.msra.mxu0 %v95_v19 }
  0x2b   :  { %365 = vset.pattern.permute.xlu1 %v399_v4  ;;  %367 = vset.pattern.permute.xlu0 %v400_v5 }
  0x2c   :  { %256 = vperm.xlu1 %365, %v471_v23   ;;  %366 = vset.pattern.permute.xlu2 %v399_v4 }
  0x2d   :  { %348 = vmatpush.bf16.xpose.msra.mxu3 %v92_v26  ;;  %114 = vmatpush.bf16.xpose.msra.mxu0 %v92_v26 }
  0x2e   :  { %260 = vperm.xlu2 %366, %v490_v30   ;;  %285 = vperm.xlu0 %367, %v471_v23  }
  0x34   :  { %264 = vperm.xlu1 %365, %v466_v22  }
  0x35   :  { %349 = vmatpush.bf16.xpose.msra.mxu3 %v89_v32  ;;  %115 = vmatpush.bf16.xpose.msra.mxu0 %v89_v32 }
  0x36   :  { %268 = vperm.xlu2 %366, %v485_v29  }
  0x3d   :  { %350 = vmatpush.bf16.xpose.msra.mxu3 %v86_v36  ;;  %116 = vmatpush.bf16.xpose.msra.mxu0 %v86_v36 }
  0x44   :  { %316 = vmatmul.msk.bf16.vlgmr.msra.gmra.mxu3 %vm78_vm0, %v338_v37  ;;  %315 = vmatmul.msk.bf16.vlgmr.msra.gmra.mxu0 %vm78_vm0, %v337_v38 }
  0x64   :  { %v148_v63 = vpop.permute.xlu2 %147 }
  0x6c   :  { %v152_v6 = vpop.permute.xlu2 %151 }
  0x76   :  { %v202_v19 = vpop.permute.xlu2 %201 }
  0x7b   :  { %v51_v41 = vpop.permute.xlu1 %50  ;;  %v61_v42 = vpop.permute.xlu0 %60 }
  0x7e   :  { %v210_v22 = vpop.permute.xlu2 %209 }
  0x83   :  { %v56_v45 = vpop.permute.xlu1 %55  ;;  %v66_v47 = vpop.permute.xlu0 %65 }
  0x88   :  { %v261_v29 = vpop.permute.xlu2 %260 }
  0x8c   :  { %v144_v1 = vpop.permute.xlu1 %143  ;;  %v140_v2 = vpop.permute.xlu0 %139 }
  0x95   :  { %v206_v21 = vpop.permute.xlu1 %205  ;;  %v214_v33 = vpop.permute.xlu0 %213 }
  0x9e   :  { %v257_v25 = vpop.permute.xlu1 %256 }
  0xa6   :  { %v265_v35 = vpop.permute.xlu1 %264 }
  0xc1   :  { %v118_v40 = vpop.f32.mrf.mxu0 }
  0xc2   :  { %v119_v49 = vadd.f32 %v118_v40, %v51_v41 }
  0xc4   :  { %v128_v54 = vmax.f32 %v119_v49, 0.0 }
  0xc7   :  { %v123_v43 = vpop.f32.mrf.mxu3 }
  0xc8   :  { %v124_v46 = vadd.f32 %v123_v43, %v61_v42  ;;  %v269_v42 = vpop.permute.xlu2 %268 }
  0xc9   :  { %v120_v44 = vpop.f32.mrf.mxu0 }
  0xca   :  { %v121_v50 = vadd.f32 %v120_v44, %v56_v45  ;;  %v130_v52 = vmax.f32 %v124_v46, 0.0 }
  0xcc   :  { %v129_v55 = vmax.f32 %v121_v50, 0.0 }
  0xce   :  { %v136_v57 = vpack.c.bf16 %v129_v55, %v128_v54 }
  0xcf   :  { %v125_v48 = vpop.f32.mrf.mxu3 }
  0xd0   :  { %v126_v51 = vadd.f32 %v125_v48, %v66_v47 }
  0xd2   :  { %v131_v53 = vmax.f32 %v126_v51, 0.0  ;;  %v286_v51 = vpop.permute.xlu0 %285 }
  0xd4   :  { %v137_v56 = vpack.c.bf16 %v131_v53, %v130_v52 }
  0xd6   :  { %177 = vmatpush.bf16.msra.mxu1 %v137_v56 }
  0xda   :  { %178 = vmatpush.bf16.msra.mxu1 %v136_v57 }
  0xdd   :  { %325 = vmatmul.msk.bf16.vlgmr.msra.gmra.mxu1 %vm164_vm1, %v339_v58 }
  0xed   :  { %326 = vmatmul.msk.bf16.gmra.mxu1 %vm164_vm1, %v340_v59 }
 0x15a   :  { %v180_v60 = vpop.f32.mrf.mxu1 }
 0x15b   :  { %v181_v10 = vadd.f32 %v180_v60, %v140_v2 }
 0x15d   :  { %v190_v15 = vmax.f32 %v181_v10, 0.0 }
 0x162   :  { %v182_v62 = vpop.f32.mrf.mxu1 }
 0x163   :  { %v183_v8 = vadd.f32 %v182_v62, %v144_v1 }
 0x165   :  { %v191_v13 = vmax.f32 %v183_v8, 0.0 }
 0x167   :  { %v198_v16 = vpack.c.bf16 %v191_v13, %v190_v15 }
 0x16a   :  { %v185_v0 = vpop.f32.mrf.mxu1 }
 0x16b   :  { %v186_v3 = vadd.f32 %v185_v0, %v148_v63 }
 0x16d   :  { %v192_v11 = vmax.f32 %v186_v3, 0.0 }
 0x172   :  { %v187_v7 = vpop.f32.mrf.mxu1 }
 0x173   :  { %v188_v9 = vadd.f32 %v187_v7, %v152_v6 }
 0x175   :  { %v193_v12 = vmax.f32 %v188_v9, 0.0 }
 0x177   :  { %v199_v14 = vpack.c.bf16 %v193_v12, %v192_v11 }
 0x179   :  { %238 = vmatpush.bf16.msra.mxu2 %v199_v14 }
 0x17d   :  { %239 = vmatpush.bf16.msra.mxu2 %v198_v16 }
 0x180   :  { %335 = vmatmul.msk.bf16.vlgmr.msra.gmra.mxu2 %vm164_vm1, %v341_v17 }
 0x190   :  { %336 = vmatmul.msk.bf16.gmra.mxu2 %vm164_vm1, %v342_v18 }
 0x203   :  { %v241_v20 = vpop.f32.mrf.mxu2 }
 0x204   :  { %v242_v27 = vadd.f32 %v241_v20, %v202_v19 }
 0x206   :  { %v251_v31 = vmax.f32 %v242_v27, 0.0 }
 0x208   :  { %v271_v37 = vmul.f32 %v257_v25, %v251_v31 }
 0x20b   :  { %v243_v23 = vpop.f32.mrf.mxu2 }
 0x20c   :  { %v244_v24 = vadd.f32 %v243_v23, %v206_v21 }
 0x20e   :  { %v252_v30 = vmax.f32 %v244_v24, 0.0 }
 0x210   :  { %v272_v34 = vmul.f32 %v261_v29, %v252_v30 }
 0x212   :  { %v275_v40 = vadd.f32 %v272_v34, %v271_v37 }
 0x213   :  { %v246_v26 = vpop.f32.mrf.mxu2 }
 0x214   :  { %v247_v28 = vadd.f32 %v246_v26, %v210_v22 }
 0x216   :  { %v253_v32 = vmax.f32 %v247_v28, 0.0 }
 0x218   :  { %v273_v38 = vmul.f32 %v265_v35, %v253_v32 }
 0x21a   :  { %v276_v43 = vadd.f32 %v275_v40, %v273_v38 }
 0x21b   :  { %v248_v36 = vpop.f32.mrf.mxu2 }
 0x21c   :  { %v249_v39 = vadd.f32 %v248_v36, %v214_v33 }
 0x21e   :  { %v254_v41 = vmax.f32 %v249_v39, 0.0 }
 0x220   :  { %v274_v44 = vmul.f32 %v269_v42, %v254_v41 }
 0x222   :  { %v277_v45 = vadd.f32 %v276_v43, %v274_v44 }
 0x224   :  { %v278_v46 = vrot.slane %v277_v45, 4 }
 0x226   :  { %v279_v47 = vadd.f32 %v278_v46, %v277_v45 }
 0x228   :  { %v280_v48 = vrot.slane %v279_v47, 2 }
 0x22a   :  { %v281_v49 = vadd.f32 %v280_v48, %v279_v47 }
 0x22c   :  { %v282_v50 = vrot.slane %v281_v49, 1 }
 0x22e   :  { %v283_v52 = vadd.f32 %v282_v50, %v281_v49 }
 0x230   :  { %v288_v53 = vadd.f32 %v286_v51, %v283_v52 }
 0x232   :  { %368 = vtanh.f32 %v288_v53 }
 0x238   :  { %v369_v54 = vpop.eup %368 }
 0x239   :  { %290 = vst [vmem:[#allocation2] sm:$0x1] %v369_v54 }
 0x23a   :  { %301 = dma.vmem_to_hbm [thread:$0]  %s297_s8, 16, %s299_s11, [#allocation3]  }
 0x23b   :  { %394 = dma.done.wait [#allocation3], 16  }
 0x23c   :  { %395 = vsyncadd [#allocation3], 4294967280 }
 0x23d   :  { %306 = vsyncpa [#allocation3], 1 }

</bundles_post_ra>
